<compile_context>
chip_gen: v5e
topology: v5e:2x2
jax: 0.10.0
libtpu: 0.0.40
codegen_flags: <defaults>
</compile_context>

<pallas_src>
import jax
import jax.numpy as jnp
from jax.experimental import pallas as pl
from jax.experimental.pallas import tpu as pltpu

N_IN = 784      # fc1 input features (no K padding; 784 is a multiple of 8)
HID = 128       # fc1 output / fc2 input features
N_OUT = 10      # real number of classes
N_PAD = 128     # lane-dense padded output width
NEG_INF = -1e30  # sentinel bias for padded logit columns (exp underflows to 0 in f32)


def mnist_kernel(x_ref, w1_ref, b1_ref, w2_ref, b2_ref, out_ref):
    # x_ref:  (bt, 784)   f32   -- cast to bf16 in VMEM just before the MXU dot
    # w1_ref: (784, 128)  bf16      b1_ref: (1, 128)  f32
    # w2_ref: (128, 128)  bf16      b2_ref: (1, 128)  f32 (cols >= 10 hold -1e30)
    # out_ref:(bt, 128)   f32       (cols >= 10 are junk; sliced off in wrapper)

    # fc1 (bf16 MXU, f32 accumulate) + bias + ReLU in f32
    x_bf16 = x_ref[...].astype(jnp.bfloat16)
    h = jnp.dot(x_bf16, w1_ref[...], preferred_element_type=jnp.float32)
    h = jnp.maximum(h + b1_ref[...], 0.0)

    # fc2 (bf16 MXU, f32 accumulate) + bias. Padded w2 columns are zero and their
    # bias is -1e30, so padded logits are -1e30 -> exp underflows to 0 below.
    logits = jnp.dot(h.astype(jnp.bfloat16), w2_ref[...],
                     preferred_element_type=jnp.float32) + b2_ref[...]

    # Numerically stable log_softmax over the last dim (f32).
    m = jnp.max(logits, axis=-1, keepdims=True)
    shifted = logits - m
    lse = jnp.log(jnp.sum(jnp.exp(shifted), axis=-1, keepdims=True))
    out_ref[...] = (shifted - lse).astype(out_ref.dtype)


def _round_up(n, m):
    return -(-n // m) * m


def _pick_batch_tile(B, *, min_tile=256, max_tile=2048, target_tiles=4):
    """Batch tile: multiple of 8, aims for >= target_tiles grid steps (v7x has 2 TCs),
    capped at max_tile so the double-buffered footprint stays well under v7x's 64 MiB VMEM."""
    bt = _round_up(max(pl.cdiv(B, target_tiles), 1), 8)
    bt = max(min(bt, max_tile), min_tile)
    bt = min(bt, _round_up(B, 8))      # never bigger than the (8-aligned) batch
    return bt


def prepare_weights(w1, b1, w2, b2):
    """One-time weight prep (hoisted out of the per-call path).

    w1 (784, 128), b1 (128,), w2 (128, 10), b2 (10,) stored as (in, out),
    i.e. PyTorch Linear weights transposed.
    """
    w1_bf = w1.astype(jnp.bfloat16)                                  # (784, 128)
    b1_2d = b1.reshape(1, HID).astype(jnp.float32)                   # (1, 128)
    w2_pad = jnp.pad(w2.astype(jnp.float32),
                     ((0, 0), (0, N_PAD - N_OUT))).astype(jnp.bfloat16)  # (128, 128)
    # Fold the padded-column mask into the bias: real cols get b2, padded cols -1e30.
    b2_pad = jnp.full((1, N_PAD), NEG_INF, dtype=jnp.float32)
    b2_pad = b2_pad.at[0, :N_OUT].set(b2.astype(jnp.float32))        # (1, 128)
    return w1_bf, b1_2d, w2_pad, b2_pad


def mnist_net_forward(x, prepared):
    """x: any shape flattening to (B, 784); returns (B, 10) f32 log-probs."""
    w1_bf, b1_2d, w2_pad, b2_pad = prepared

    x2d = x.reshape(-1, N_IN).astype(jnp.float32)
    B = x2d.shape[0]

    bt = _pick_batch_tile(B)
    n_tiles = pl.cdiv(B, bt)
    B_grid = n_tiles * bt
    if B_grid != B:  # pad only when the tile doesn't divide B (guaranteed no-op otherwise)
        x2d = jnp.pad(x2d, ((0, B_grid - B), (0, 0)))

    cost = pl.CostEstimate(
        flops=2 * B_grid * (N_IN * HID + HID * N_PAD),
        transcendentals=B_grid * (N_PAD + 1),
        bytes_accessed=(x2d.size * 4 + w1_bf.size * 2 + w2_pad.size * 2
                        + b1_2d.size * 4 + b2_pad.size * 4 + B_grid * N_PAD * 4),
    )

    out_pad = pl.pallas_call(
        mnist_kernel,
        out_shape=jax.ShapeDtypeStruct((B_grid, N_PAD), jnp.float32),
        grid_spec=pl.GridSpec(
            grid=(n_tiles,),
            in_specs=[
                pl.BlockSpec((bt, N_IN), lambda i: (i, 0)),    # x tiles over batch (f32)
                pl.BlockSpec((N_IN, HID), lambda i: (0, 0)),   # weights stay VMEM-resident
                pl.BlockSpec((1, HID), lambda i: (0, 0)),
                pl.BlockSpec((HID, N_PAD), lambda i: (0, 0)),
                pl.BlockSpec((1, N_PAD), lambda i: (0, 0)),
            ],
            out_specs=pl.BlockSpec((bt, N_PAD), lambda i: (i, 0)),
        ),
        compiler_params=pltpu.CompilerParams(
            dimension_semantics=("parallel",),
            vmem_limit_bytes=48 * 1024 * 1024,  # bt=2048 worst case ~16 MiB double-buffered
        ),
        cost_estimate=cost,
    )(x2d, w1_bf, b1_2d, w2_pad, b2_pad)

    # TODO(synk): fusing the consumer (argmax / NLL) into the kernel would remove this slice pass.
    return out_pad[:B, :N_OUT]


def init_params(key):
    """Mimic nn.Linear uniform(-1/sqrt(fan_in), 1/sqrt(fan_in)) init; weights stored (in, out)."""
    k1, k2, k3, k4 = jax.random.split(key, 4)
    bound1 = 1.0 / jnp.sqrt(784.0)
    bound2 = 1.0 / jnp.sqrt(128.0)
    w1 = jax.random.uniform(k1, (N_IN, HID), jnp.float32, -bound1, bound1)
    b1 = jax.random.uniform(k2, (HID,), jnp.float32, -bound1, bound1)
    w2 = jax.random.uniform(k3, (HID, N_OUT), jnp.float32, -bound2, bound2)
    b2 = jax.random.uniform(k4, (N_OUT,), jnp.float32, -bound2, bound2)
    return w1, b1, w2, b2


def _reference_forward(x, w1, b1, w2, b2):
    x2d = x.reshape(-1, N_IN).astype(jnp.float32)
    h = jnp.maximum(x2d @ w1 + b1, 0.0)
    logits = h @ w2 + b2
    return jax.nn.log_softmax(logits, axis=-1)


if __name__ == "__main__":
    key = jax.random.PRNGKey(0)
    kx, kp = jax.random.split(key)

    # Small MNIST-like batch: (B=8, C=1, H=28, W=28) NCHW, like PyTorch would feed.
    x = jax.random.normal(kx, (8, 1, 28, 28), jnp.float32)
    w1, b1, w2, b2 = init_params(kp)

    prepared = prepare_weights(w1, b1, w2, b2)   # one-time weight prep
    out = mnist_net_forward(x, prepared)
    out = jax.block_until_ready(out)

    assert out.shape == (8, N_OUT)

    # log_softmax rows sum (in prob space) to ~1.
    probs_sum = jnp.sum(jnp.exp(out), axis=1)
    assert jnp.allclose(probs_sum, 1.0, atol=1e-3), probs_sum

    # Match the f32 pure-JAX reference. Loose tolerance: bf16 MXU inputs (x, h, weights)
    # introduce ~1e-2-level error; fine for MNIST logits.
    ref = _reference_forward(x, w1, b1, w2, b2)
    assert jnp.max(jnp.abs(out - ref)) < 0.1, jnp.max(jnp.abs(out - ref))

    print("KERNEL_OK")
</pallas_src>

<mosaic_0001>
module attributes {stable_mosaic.version = 11 : i64} {
  func.func @mnist_kernel(%arg0: i32, %arg1: memref<8x784xf32, #tpu.memory_space<vmem>>, %arg2: memref<784x128xbf16, #tpu.memory_space<vmem>>, %arg3: memref<1x128xf32, #tpu.memory_space<vmem>>, %arg4: memref<128x128xbf16, #tpu.memory_space<vmem>>, %arg5: memref<1x128xf32, #tpu.memory_space<vmem>>, %arg6: memref<8x128xf32, #tpu.memory_space<vmem>>) attributes {dimension_semantics = [#tpu.dimension_semantics<parallel>], iteration_bounds = array<i64: 1>, scalar_prefetch = 0 : i64, scratch_operands = 0 : i64, tpu.core_type = #tpu.core_type<tc>, window_params = [{transform_indices = @transform_0, window_bounds = array<i64: 8, 784>}, {pipeline_mode = #tpu.pipeline_mode<synchronous>, transform_indices = @transform_1, window_bounds = array<i64: 784, 128>}, {pipeline_mode = #tpu.pipeline_mode<synchronous>, transform_indices = @transform_2, window_bounds = array<i64: 1, 128>}, {pipeline_mode = #tpu.pipeline_mode<synchronous>, transform_indices = @transform_3, window_bounds = array<i64: 128, 128>}, {pipeline_mode = #tpu.pipeline_mode<synchronous>, transform_indices = @transform_4, window_bounds = array<i64: 1, 128>}, {transform_indices = @transform_5, window_bounds = array<i64: 8, 128>}]} {
    %c0 = arith.constant 0 : index
    %c0_0 = arith.constant 0 : index
    %0 = vector.load %arg1[%c0, %c0_0] : memref<8x784xf32, #tpu.memory_space<vmem>>, vector<8x784xf32>
    %1 = arith.truncf %0 : vector<8x784xf32> to vector<8x784xbf16>
    %c0_1 = arith.constant 0 : index
    %c0_2 = arith.constant 0 : index
    %2 = vector.load %arg2[%c0_1, %c0_2] : memref<784x128xbf16, #tpu.memory_space<vmem>>, vector<784x128xbf16>
    %cst = arith.constant dense<0.000000e+00> : vector<8x128xf32>
    %3 = tpu.matmul %1, %2, %cst {dimension_numbers = #tpu.dot_dimension_numbers<[1], [0], [0], [1], [0, 0, 1, 1], [], []>} : vector<8x784xbf16>, vector<784x128xbf16>, vector<8x128xf32> -> vector<8x128xf32>
    %c0_3 = arith.constant 0 : index
    %c0_4 = arith.constant 0 : index
    %4 = vector.load %arg3[%c0_3, %c0_4] : memref<1x128xf32, #tpu.memory_space<vmem>>, vector<1x128xf32>
    %5 = vector.broadcast %4 : vector<1x128xf32> to vector<8x128xf32>
    %6 = arith.addf %3, %5 : vector<8x128xf32>
    %cst_5 = arith.constant 0.000000e+00 : f32
    %7 = vector.broadcast %cst_5 : f32 to vector<8x128xf32>
    %8 = arith.maximumf %6, %7 : vector<8x128xf32>
    %9 = arith.truncf %8 : vector<8x128xf32> to vector<8x128xbf16>
    %c0_6 = arith.constant 0 : index
    %c0_7 = arith.constant 0 : index
    %10 = vector.load %arg4[%c0_6, %c0_7] : memref<128x128xbf16, #tpu.memory_space<vmem>>, vector<128x128xbf16>
    %cst_8 = arith.constant dense<0.000000e+00> : vector<8x128xf32>
    %11 = tpu.matmul %9, %10, %cst_8 {dimension_numbers = #tpu.dot_dimension_numbers<[1], [0], [0], [1], [0, 0, 1, 1], [], []>} : vector<8x128xbf16>, vector<128x128xbf16>, vector<8x128xf32> -> vector<8x128xf32>
    %c0_9 = arith.constant 0 : index
    %c0_10 = arith.constant 0 : index
    %12 = vector.load %arg5[%c0_9, %c0_10] : memref<1x128xf32, #tpu.memory_space<vmem>>, vector<1x128xf32>
    %13 = vector.broadcast %12 : vector<1x128xf32> to vector<8x128xf32>
    %14 = arith.addf %11, %13 : vector<8x128xf32>
    %cst_11 = arith.constant dense<0xFF800000> : vector<8xf32>
    %15 = vector.multi_reduction <maximumf>, %14, %cst_11 [1] : vector<8x128xf32> to vector<8xf32>
    %16 = vector.shape_cast %15 : vector<8xf32> to vector<8x1xf32>
    %17 = vector.broadcast %16 : vector<8x1xf32> to vector<8x128xf32>
    %18 = arith.subf %14, %17 : vector<8x128xf32>
    %19 = math.exp %18 : vector<8x128xf32>
    %cst_12 = arith.constant dense<0.000000e+00> : vector<8xf32>
    %20 = vector.multi_reduction <add>, %19, %cst_12 [1] : vector<8x128xf32> to vector<8xf32>
    %21 = vector.shape_cast %20 : vector<8xf32> to vector<8x1xf32>
    %22 = math.log %21 : vector<8x1xf32>
    %23 = vector.broadcast %22 : vector<8x1xf32> to vector<8x128xf32>
    %24 = arith.subf %18, %23 : vector<8x128xf32>
    %c0_13 = arith.constant 0 : index
    %c0_14 = arith.constant 0 : index
    %25 = vector.load %arg6[%c0_13, %c0_14] : memref<8x128xf32, #tpu.memory_space<vmem>>, vector<8x128xf32>
    tpu.vector_store %arg6[%c0_13, %c0_14], %24 {strides = array<i32>} : memref<8x128xf32, #tpu.memory_space<vmem>>, vector<8x128xf32>,
    return
  }
  func.func @transform_0(%arg0: i32) -> (i32, i32) {
    %c0_i32 = arith.constant 0 : i32
    %c0_i32_0 = arith.constant 0 : i32
    return %arg0, %c0_i32 : i32, i32
  }
  func.func @transform_1(%arg0: i32) -> (i32, i32) {
    %c0_i32 = arith.constant 0 : i32
    %c0_i32_0 = arith.constant 0 : i32
    %c0_i32_1 = arith.constant 0 : i32
    return %c0_i32, %c0_i32_0 : i32, i32
  }
  func.func @transform_2(%arg0: i32) -> (i32, i32) {
    %c0_i32 = arith.constant 0 : i32
    %c0_i32_0 = arith.constant 0 : i32
    %c0_i32_1 = arith.constant 0 : i32
    return %c0_i32, %c0_i32_0 : i32, i32
  }
  func.func @transform_3(%arg0: i32) -> (i32, i32) {
    %c0_i32 = arith.constant 0 : i32
    %c0_i32_0 = arith.constant 0 : i32
    %c0_i32_1 = arith.constant 0 : i32
    return %c0_i32, %c0_i32_0 : i32, i32
  }
  func.func @transform_4(%arg0: i32) -> (i32, i32) {
    %c0_i32 = arith.constant 0 : i32
    %c0_i32_0 = arith.constant 0 : i32
    %c0_i32_1 = arith.constant 0 : i32
    return %c0_i32, %c0_i32_0 : i32, i32
  }
  func.func @transform_5(%arg0: i32) -> (i32, i32) {
    %c0_i32 = arith.constant 0 : i32
    %c0_i32_0 = arith.constant 0 : i32
    return %arg0, %c0_i32 : i32, i32
  }
}

</mosaic_0001>

<bundles_post_ra>
// kernel: tpu_custom_call.1
= control target key start
LH: loop header
LB: loop body
LE: loop exit
PB: predicated region body
PF: predicated region fallthrough
CT: control target
= control target key end

     0   :  { %10 = vsyncpa [#allocation3], 0  ;;  %s1138_s0 = inlined_call_operand.hbm [shape: f32[8,784], index: 0, kind: input, shape index: {}]   ;;  %s1139_s1 = inlined_call_operand.hbm [shape: bf16[784,128], index: 1, kind: input, shape index: {}]   ;;  %s1140_s2 = inlined_call_operand.vmem [shape: f32[1,128], index: 2, kind: input, shape index: {}]   ;;  %s1141_s3 = inlined_call_operand.hbm [shape: bf16[128,128], index: 3, kind: input, shape index: {}]   ;;  %s1142_s4 = inlined_call_operand.vmem [shape: f32[1,128], index: 4, kind: input, shape index: {}]   ;;  %s1143_s5 = inlined_call_operand.hbm [shape: f32[8,128], index: 5, kind: output, shape index: {}]  }
   0x1   :  { %11 = vsyncpa [#allocation6], 0  ;;  %s28_s20 = sshll.u32 %s1139_s1, 4  ;;  %s29_s20 = int_to_ptr.hbm [resolvable:$true] %s28_s20 }
   0x2   :  { %12 = vsyncpa [#allocation4], 0  ;;  %s1084_s21 = smov [#allocation5]   ;;  %s18_s25 = sshll.u32 %s1138_s0, 4  ;;  %s19_s25 = int_to_ptr.hbm [resolvable:$true] %s18_s25 }
   0x3   :  { %s30_s22 = sshll.u32 %s1084_s21, 4  ;;  %s1085_s26 = smov 64   ;;  %s31_s22 = int_to_ptr.vmem [resolvable:$true] %s30_s22 }
   0x4   :  { %s1086_s27 = smov 4   ;;  %s1087_s28 = smov [#allocation2]  }
   0x5   :  { %36 = dma.hbm_to_vmem [thread:$0]  %s29_s20, 6272, %s31_s22, [#allocation6], %s1085_s26, %s1085_s26, %s1086_s27  }
   0x6   :  { %s20_s29 = sshll.u32 %s1087_s28, 4  ;;  %s43_s7 = sshll.u32 %s1141_s3, 4  ;;  %s21_s29 = int_to_ptr.vmem [resolvable:$true] %s20_s29  ;;  %s44_s7 = int_to_ptr.hbm [resolvable:$true] %s43_s7 }
   0x7   :  { %23 = dma.hbm_to_vmem [thread:$0]  %s19_s25, 896, %s21_s29, [#allocation3]  }
   0x8   :  { %s1088_s1 = smov [#allocation7]  }
   0x9   :  { %s45_s8 = sshll.u32 %s1088_s1, 4  ;;  %s46_s8 = int_to_ptr.vmem [resolvable:$true] %s45_s8 }
   0xa   :  { %51 = dma.hbm_to_vmem [thread:$0]  %s44_s7, 1024, %s46_s8, [#allocation6], %s1085_s26, %s1085_s26, %s1086_s27  }
   0xb   :  { %1078 = dma.done.wait [#allocation3], 896  }
   0xc   :  { %1079 = vsyncadd [#allocation3], 4294966400 }
   0xd   :  { %1080 = dma.done.wait [#allocation6], 7296  }
   0xe   :  { %1081 = vsyncadd [#allocation6], 4294960000  ;;  %v920_v0 = vld [vmem:[#allocation5 + $0x38] sm:$0xff]  ;;  %v919_v3 = vld [vmem:[#allocation5 + $0x30] sm:$0xff]  ;;  %vm477_vm0 = vcmask 130048   ;;  %s1089_s10 = smov [#allocation8]  }
   0xf   :  { %v928_v1 = vld [vmem:[#allocation5 + $0x78] sm:$0xff]  ;;  %481 = vmatpush.bf16.msra.mxu0 %v920_v0  ;;  %v927_v4 = vld [vmem:[#allocation5 + $0x70] sm:$0xff]  ;;  %v918_v8 = vld [vmem:[#allocation5 + $0x28] sm:$0xff]  ;;  %s671_s11 = sshll.u32 %s1089_s10, 4  ;;  %s673_s14 = sshll.u32 %s1143_s5, 4  ;;  %s672_s11 = int_to_ptr.vmem [resolvable:$true] %s671_s11  ;;  %s674_s14 = int_to_ptr.hbm [resolvable:$true] %s673_s14 }
  0x10   :  { %v936_v2 = vld [vmem:[#allocation5 + $0xb8] sm:$0xff]  ;;  %494 = vmatpush.bf16.msra.mxu1 %v928_v1  ;;  %v935_v5 = vld [vmem:[#allocation5 + $0xb0] sm:$0xff]  ;;  %v926_v9 = vld [vmem:[#allocation5 + $0x68] sm:$0xff] }
  0x11   :  { %507 = vmatpush.bf16.msra.mxu2 %v936_v2  ;;  %v944_v6 = vld [vmem:[#allocation5 + $0xf8] sm:$0xff]  ;;  %v943_v7 = vld [vmem:[#allocation5 + $0xf0] sm:$0xff]  ;;  %v934_v10 = vld [vmem:[#allocation5 + $0xa8] sm:$0xff] }
  0x12   :  { %520 = vmatpush.bf16.msra.mxu3 %v944_v6  ;;  %v942_v11 = vld [vmem:[#allocation5 + $0xe8] sm:$0xff]  ;;  %v917_v12 = vld [vmem:[#allocation5 + $0x20] sm:$0xff]  ;;  %v916_v16 = vld [vmem:[#allocation5 + $0x18] sm:$0xff] }
  0x13   :  { %482 = vmatpush.bf16.msra.mxu0 %v919_v3  ;;  %v925_v13 = vld [vmem:[#allocation5 + $0x60] sm:$0xff]  ;;  %v924_v17 = vld [vmem:[#allocation5 + $0x58] sm:$0xff]  ;;  %v915_v20 = vld [vmem:[#allocation5 + $0x10] sm:$0xff] }
  0x14   :  { %495 = vmatpush.bf16.msra.mxu1 %v927_v4  ;;  %v933_v14 = vld [vmem:[#allocation5 + $0xa0] sm:$0xff]  ;;  %v932_v18 = vld [vmem:[#allocation5 + $0x98] sm:$0xff]  ;;  %v923_v21 = vld [vmem:[#allocation5 + $0x50] sm:$0xff] }
  0x15   :  { %508 = vmatpush.bf16.msra.mxu2 %v935_v5  ;;  %v941_v15 = vld [vmem:[#allocation5 + $0xe0] sm:$0xff]  ;;  %v940_v19 = vld [vmem:[#allocation5 + $0xd8] sm:$0xff]  ;;  %v931_v22 = vld [vmem:[#allocation5 + $0x90] sm:$0xff] }
  0x16   :  { %521 = vmatpush.bf16.msra.mxu3 %v943_v7  ;;  %v939_v23 = vld [vmem:[#allocation5 + $0xd0] sm:$0xff]  ;;  %v914_v24 = vld [vmem:[#allocation5 + $0x8] sm:$0xff]  ;;  %v913_v27 = vld [vmem:[#allocation5] sm:$0xff] }
  0x17   :  { %483 = vmatpush.bf16.msra.mxu0 %v918_v8  ;;  %v922_v25 = vld [vmem:[#allocation5 + $0x48] sm:$0xff]  ;;  %v921_v29 = vld [vmem:[#allocation5 + $0x40] sm:$0xff]  ;;  %v68_v31 = vld [vmem:[#allocation2 + $0x8] sm:$0xff] }
  0x18   :  { %496 = vmatpush.bf16.msra.mxu1 %v926_v9  ;;  %v930_v26 = vld [vmem:[#allocation5 + $0x88] sm:$0xff]  ;;  %v952_v32 = vld [vmem:[#allocation5 + $0x138] sm:$0xff]  ;;  %v929_v34 = vld [vmem:[#allocation5 + $0x80] sm:$0xff]  ;;  %v75_v37 = vpack.c.bf16 %v68_v31, %v68_v31 }
  0x19   :  { %509 = vmatpush.bf16.msra.mxu2 %v934_v10  ;;  %v938_v28 = vld [vmem:[#allocation5 + $0xc8] sm:$0xff]  ;;  %v960_v33 = vld [vmem:[#allocation5 + $0x178] sm:$0xff]  ;;  %v937_v38 = vld [vmem:[#allocation5 + $0xc0] sm:$0xff] }
  0x1a   :  { %522 = vmatpush.bf16.msra.mxu3 %v942_v11  ;;  %v67_v30 = vld [vmem:[#allocation2] sm:$0xff]  ;;  %v69_v35 = vld [vmem:[#allocation2 + $0x10] sm:$0xff]  ;;  %v961_v39 = vld [vmem:[#allocation5 + $0x180] sm:$0xff] }
  0x1b   :  { %484 = vmatpush.bf16.msra.mxu0 %v917_v12  ;;  %v74_v36 = vpack.c.bf16 %v67_v30, %v67_v30  ;;  %v70_v40 = vld [vmem:[#allocation2 + $0x18] sm:$0xff]  ;;  %v951_v41 = vld [vmem:[#allocation5 + $0x130] sm:$0xff]  ;;  %v76_v43 = vpack.c.bf16 %v69_v35, %v69_v35  ;;  %v950_v45 = vld [vmem:[#allocation5 + $0x128] sm:$0xff] }
  0x1c   :  { %497 = vmatpush.bf16.msra.mxu1 %v925_v13  ;;  %v959_v42 = vld [vmem:[#allocation5 + $0x170] sm:$0xff]  ;;  %v77_v44 = vpack.c.bf16 %v70_v40, %v70_v40  ;;  %v958_v46 = vld [vmem:[#allocation5 + $0x168] sm:$0xff]  ;;  %v949_v47 = vld [vmem:[#allocation5 + $0x120] sm:$0xff] }
  0x1d   :  { %510 = vmatpush.bf16.msra.mxu2 %v933_v14  ;;  %v957_v48 = vld [vmem:[#allocation5 + $0x160] sm:$0xff]  ;;  %v948_v49 = vld [vmem:[#allocation5 + $0x118] sm:$0xff]  ;;  %v947_v52 = vld [vmem:[#allocation5 + $0x110] sm:$0xff] }
  0x1e   :  { %523 = vmatpush.bf16.msra.mxu3 %v941_v15  ;;  %v956_v50 = vld [vmem:[#allocation5 + $0x158] sm:$0xff]  ;;  %v955_v53 = vld [vmem:[#allocation5 + $0x150] sm:$0xff]  ;;  %v946_v55 = vld [vmem:[#allocation5 + $0x108] sm:$0xff] }
  0x1f   :  { %485 = vmatpush.bf16.msra.mxu0 %v916_v16  ;;  %v73_v51 = vld [vmem:[#allocation2 + $0x30] sm:$0xff]  ;;  %v954_v56 = vld [vmem:[#allocation5 + $0x148] sm:$0xff]  ;;  %v945_v57 = vld [vmem:[#allocation5 + $0x100] sm:$0xff] }
  0x20   :  { %498 = vmatpush.bf16.msra.mxu1 %v924_v17  ;;  %v80_v54 = vpack.c.bf16 %v73_v51, %v73_v51  ;;  %v953_v58 = vld [vmem:[#allocation5 + $0x140] sm:$0xff]  ;;  %v71_v59 = vld [vmem:[#allocation2 + $0x20] sm:$0xff]  ;;  %v72_v60 = vld [vmem:[#allocation2 + $0x28] sm:$0xff] }
  0x21   :  { %511 = vmatpush.bf16.msra.mxu2 %v932_v18  ;;  %v78_v61 = vpack.c.bf16 %v71_v59, %v71_v59  ;;  %v79_v62 = vpack.c.bf16 %v72_v60, %v72_v60  ;;  %v969_v63 = vld [vmem:[#allocation7 + $0x38] sm:$0xff]  ;;  %v968_v0 = vld [vmem:[#allocation7 + $0x30] sm:$0xff]  ;;  %v967_v1 = vld [vmem:[#allocation7 + $0x28] sm:$0xff] }
  0x22   :  { %524 = vmatpush.bf16.msra.mxu3 %v940_v19  ;;  %v966_v2 = vld [vmem:[#allocation7 + $0x20] sm:$0xff]  ;;  %v965_v3 = vld [vmem:[#allocation7 + $0x18] sm:$0xff]  ;;  %v964_v4 = vld [vmem:[#allocation7 + $0x10] sm:$0xff] }
  0x23   :  { %486 = vmatpush.bf16.msra.mxu0 %v915_v20  ;;  %v963_v5 = vld [vmem:[#allocation7 + $0x8] sm:$0xff]  ;;  %v962_v8 = vld [vmem:[#allocation7] sm:$0xff] }
  0x24   :  { %499 = vmatpush.bf16.msra.mxu1 %v923_v21  ;;  %v976_v13 = vld [vmem:[%s1140_s2] ss:$0 sm:$0xff] }
  0x25   :  { %512 = vmatpush.bf16.msra.mxu2 %v931_v22  ;;  %v977_v31 = vld [vmem:[%s1142_s4] ss:$0 sm:$0xff] }
  0x26   :  { %525 = vmatpush.bf16.msra.mxu3 %v939_v23 }
  0x27   :  { %487 = vmatpush.bf16.msra.mxu0 %v914_v24 }
  0x28   :  { %500 = vmatpush.bf16.msra.mxu1 %v922_v25 }
  0x29   :  { %513 = vmatpush.bf16.msra.mxu2 %v930_v26 }
  0x2a   :  { %526 = vmatpush.bf16.msra.mxu3 %v938_v28 }
  0x2b   :  { %488 = vmatpush.bf16.msra.mxu0 %v913_v27 }
  0x2c   :  { %501 = vmatpush.bf16.msra.mxu1 %v921_v29 }
  0x2d   :  { %514 = vmatpush.bf16.msra.mxu2 %v929_v34 }
  0x2e   :  { %489 = vmatmul.bf16.vlgmr.msra.gmra.mxu0 %v74_v36  ;;  %527 = vmatpush.bf16.msra.mxu3 %v937_v38 }
  0x2f   :  { %533 = vmatpush.bf16.msrb.mxu0 %v952_v32  ;;  %502 = vmatmul.bf16.vlgmr.msra.gmra.mxu1 %v75_v37 }
  0x30   :  { %546 = vmatpush.bf16.msrb.mxu1 %v960_v33  ;;  %515 = vmatmul.bf16.vlgmr.msra.gmra.mxu2 %v76_v43 }
  0x31   :  { %566 = vmatpush.bf16.msrb.mxu2 %v961_v39  ;;  %528 = vmatmul.bf16.vlgmr.msra.gmra.mxu3 %v77_v44 }
  0x32   :  { %642 = vmatpush.bf16.msrb.mxu3 %v969_v63 }
  0x33   :  { %534 = vmatpush.bf16.msrb.mxu0 %v951_v41 }
  0x34   :  { %547 = vmatpush.bf16.msrb.mxu1 %v959_v42 }
  0x36   :  { %643 = vmatpush.bf16.msrb.mxu3 %v968_v0 }
  0x37   :  { %535 = vmatpush.bf16.msrb.mxu0 %v950_v45 }
  0x38   :  { %548 = vmatpush.bf16.msrb.mxu1 %v958_v46 }
  0x3a   :  { %644 = vmatpush.bf16.msrb.mxu3 %v967_v1 }
  0x3b   :  { %536 = vmatpush.bf16.msrb.mxu0 %v949_v47 }
  0x3c   :  { %549 = vmatpush.bf16.msrb.mxu1 %v957_v48 }
  0x3e   :  { %645 = vmatpush.bf16.msrb.mxu3 %v966_v2 }
  0x3f   :  { %537 = vmatpush.bf16.msrb.mxu0 %v948_v49 }
  0x40   :  { %550 = vmatpush.bf16.msrb.mxu1 %v956_v50  ;;  %880 = vmatmul.msk.bf16.vlgmr.msrb.gmra.mxu2 %vm477_vm0, %v80_v54 }
  0x42   :  { %646 = vmatpush.bf16.msrb.mxu3 %v965_v3 }
  0x43   :  { %538 = vmatpush.bf16.msrb.mxu0 %v947_v52 }
  0x44   :  { %551 = vmatpush.bf16.msrb.mxu1 %v955_v53 }
  0x46   :  { %647 = vmatpush.bf16.msrb.mxu3 %v964_v4 }
  0x47   :  { %539 = vmatpush.bf16.msrb.mxu0 %v946_v55 }
  0x48   :  { %552 = vmatpush.bf16.msrb.mxu1 %v954_v56 }
  0x4a   :  { %648 = vmatpush.bf16.msrb.mxu3 %v963_v5 }
  0x4b   :  { %540 = vmatpush.bf16.msrb.mxu0 %v945_v57 }
  0x4c   :  { %553 = vmatpush.bf16.msrb.mxu1 %v953_v58 }
  0x4e   :  { %541 = vmatmul.bf16.vlgmr.msrb.gmra.mxu0 %v78_v61  ;;  %649 = vmatpush.bf16.msrb.mxu3 %v962_v8 }
  0x4f   :  { %554 = vmatmul.bf16.vlgmr.msrb.gmra.mxu1 %v79_v62 }
  0xab   :  { %v490_v6 = vpop.f32.mrf.mxu0 }
  0xac   :  { %v503_v7 = vpop.f32.mrf.mxu1  ;;  %v491_v14 = vadd.f32 %v976_v13, %v490_v6 }
  0xae   :  { %v504_v17 = vadd.f32 %v503_v7, %v491_v14 }
  0xb3   :  { %v492_v9 = vpop.f32.mrf.mxu0  ;;  %v516_v11 = vpop.f32.mrf.mxu2 }
  0xb4   :  { %v505_v10 = vpop.f32.mrf.mxu1  ;;  %v529_v12 = vpop.f32.mrf.mxu3  ;;  %v517_v18 = vadd.f32 %v516_v11, %v504_v17 }
  0xb6   :  { %v530_v20 = vadd.f32 %v529_v12, %v517_v18 }
  0xbb   :  { %v518_v15 = vpop.f32.mrf.mxu2 }
  0xbc   :  { %v531_v16 = vpop.f32.mrf.mxu3 }
  0xc3   :  { %v568_v19 = vpop.f32.mrf.mxu2 }
  0xcb   :  { %v542_v21 = vpop.f32.mrf.mxu0  ;;  %v570_v25 = vpop.f32.mrf.mxu2 }
  0xcc   :  { %v555_v22 = vpop.f32.mrf.mxu1  ;;  %v543_v23 = vadd.f32 %v542_v21, %v530_v20 }
  0xce   :  { %v556_v24 = vadd.f32 %v555_v22, %v543_v23 }
  0xd0   :  { %v569_v26 = vadd.f32 %v568_v19, %v556_v24 }
  0xd2   :  { %v572_v27 = vmax.f32 %v569_v26, 0.0 }
  0xd3   :  { %v544_v28 = vpop.f32.mrf.mxu0 }
  0xd4   :  { %v557_v29 = vpop.f32.mrf.mxu1  ;;  %v573_v30 = vpack.c.bf16 %v572_v27, %v572_v27 }
  0xd6   :  { %650 = vmatmul.bf16.vlgmr.msrb.gmra.mxu3 %v573_v30 }
 0x159   :  { %v651_v32 = vpop.f32.mrf.mxu3 }
 0x15a   :  { %v652_v33 = vadd.f32 %v977_v31, %v651_v32 }
 0x15c   :  { %655 = vmax.xlane.f32.xlu0 %v652_v33 }
 0x161   :  { %v653_v34 = vpop.f32.mrf.mxu3 }
 0x1cf   :  { %v656_v35 = vpop.xlane.xlu0 %655 }
 0x1d0   :  { %v657_v36 = vsub.f32 %v652_v33, %v656_v35 }
 0x1d2   :  { %v658_v37 = vmul.f32 1.442695, %v657_v36 }
 0x1d4   :  { %978 = vpow2.f32 %v658_v37 }
 0x1da   :  { %v979_v38 = vpop.eup %978 }
 0x1db   :  { %660 = vadd.xlane.f32.xlu0 %v979_v38 }
 0x24e   :  { %v661_v39 = vpop.xlane.xlu0 %660 }
 0x24f   :  { %980 = vlog2.f32 %v661_v39 }
 0x255   :  { %v981_v40 = vpop.eup %980 }
 0x256   :  { %v663_v41 = vmul.f32 0.6931472, %v981_v40 }
 0x258   :  { %v664_v42 = vsub.f32 %v657_v36, %v663_v41 }
 0x25a   :  { %665 = vst [vmem:[#allocation8] sm:$0xff] %v664_v42 }
 0x25b   :  { %676 = dma.vmem_to_hbm [thread:$0]  %s672_s11, 128, %s674_s14, [#allocation4]  }
 0x25c   :  { %1082 = dma.done.wait [#allocation4], 128  }
 0x25d   :  { %1083 = vsyncadd [#allocation4], 4294967168 }
 0x25e   :  { %681 = vsyncpa [#allocation3], 1 }
 0x25f   :  { %682 = vsyncpa [#allocation6], 1 }
 0x260   :  { %683 = vsyncpa [#allocation4], 1 }

</bundles_post_ra>
